<compile_context>
chip_gen: v5e
topology: v5e:2x2
jax: 0.10.0
libtpu: 0.0.40
codegen_flags: <defaults>
</compile_context>

<pallas_src>
import math

import jax
import jax.numpy as jnp
from jax.experimental import pallas as pl
from jax.experimental.pallas import tpu as pltpu

_LANE = 128
_MIB = 1024 * 1024


def make_positional_encoding(d_model: int, max_len: int = 5000) -> jnp.ndarray:
    """Deterministic buffer init — mirrors the PyTorch __init__ exactly."""
    position = jnp.arange(0, max_len, dtype=jnp.float32)[:, None]          # (max_len, 1)
    div_term = jnp.exp(
        jnp.arange(0, d_model, 2, dtype=jnp.float32) * (-math.log(10000.0) / d_model)
    )                                                                      # (d_model/2,)
    angles = position * div_term                                           # (max_len, d_model/2)
    pe = jnp.zeros((max_len, d_model), dtype=jnp.float32)
    pe = pe.at[:, 0::2].set(jnp.sin(angles))
    pe = pe.at[:, 1::2].set(jnp.cos(angles))
    return pe                                                              # (max_len, d_model)


# ------------------------------ kernels ------------------------------------ #

def _pe_add_batched_kernel(x_ref, pe_ref, o_ref):
    # Regime A: x/o tiles are (TB, R, C); pe is the full (R, C) resident slab.
    x = x_ref[...].astype(jnp.float32)
    o_ref[...] = (x + pe_ref[...][None, :, :]).astype(o_ref.dtype)


def _pe_add_rows_kernel(x_ref, pe_ref, o_ref):
    # Regime B: x/pe/o are (TR, C) tiles (x/o batch dim squeezed away).
    o_ref[...] = (x_ref[...].astype(jnp.float32) + pe_ref[...]).astype(o_ref.dtype)


# --------------------------- layout / sizing helpers ------------------------ #

def _pick_lane_cols(flat: int):
    """Largest multiple-of-128 factor of `flat` (capped at 16*128), or None."""
    if flat % _LANE != 0:
        return None
    best = None
    c = _LANE
    while c <= min(flat, 16 * _LANE):
        if flat % c == 0:
            best = c
        c += _LANE
    return best


def _lane_dense_view(B: int, S: int, D: int):
    """Pick a row-major lane-dense re-view.

    Returns (mode, R, C):
      mode == "per_batch": each batch slab (S, D) is viewed as (R, C).
      mode == "flat_all":  the whole (B, S, D) extent is viewed as (R, C)
                           (pe is materialised per batch — tiny shapes only).
    """
    if D % _LANE == 0:
        return "per_batch", S, D
    c = _pick_lane_cols(S * D)
    if c is not None:
        return "per_batch", (S * D) // c, c
    c = _pick_lane_cols(B * S * D)
    if c is not None:
        return "flat_all", (B * S * D) // c, c
    # TODO(synk): B*S*D not divisible by 128 keeps masked (vst.msk) stores.
    return "per_batch", S, D


def _vmem_limit_bytes() -> int:
    """~70% of physical VMEM: ≈45 MiB on v7x (64 MiB), ≈90 MiB on v5e/v6e (128 MiB)."""
    try:
        cap = int(pltpu.get_tpu_info().vmem_capacity_bytes)
    except Exception:
        cap = 64 * _MIB  # conservative fallback (v7x physical VMEM)
    return int(cap * 0.70)


# ------------------------------ wrapper ------------------------------------ #

def positional_encoding_forward(x: jnp.ndarray, pe: jnp.ndarray, *, donate_x: bool = False) -> jnp.ndarray:
    """x: (B, S, D) batch-first; pe: (max_len, D).  Returns x + pe[None, :S, :].

    Output dtype follows NumPy/Torch promotion (pe is float32), matching the
    PyTorch forward exactly.
    """
    B, S, D = x.shape
    max_len, d_model = pe.shape
    assert D == d_model, f"d_model mismatch: x has {D}, pe has {d_model}"
    assert S <= max_len, f"sequence length {S} exceeds max_len {max_len}"

    out_dtype = jnp.promote_types(x.dtype, pe.dtype)   # f32 for f32/bf16/fp16 x
    pe_slice = pe[:S]                                  # stays f32 — add is done in f32 in-kernel

    mode, R, C = _lane_dense_view(B, S, D)
    if mode == "per_batch":
        B_eff = B
        same_view = (R, C) == (S, D)
        x_view = x if same_view else x.reshape(B, R, C)
        pe_view = pe_slice if same_view else pe_slice.reshape(R, C)
    else:  # "flat_all": fold batch into rows; pe replicated per batch (only for tiny, awkward shapes).
        B_eff = 1
        x_view = x.reshape(1, R, C)
        pe_view = jnp.broadcast_to(pe_slice[None, :, :], (B, S, D)).reshape(R, C)

    x_item = jnp.dtype(x.dtype).itemsize
    pe_item = jnp.dtype(pe_view.dtype).itemsize
    out_item = jnp.dtype(out_dtype).itemsize

    vmem_limit = _vmem_limit_bytes()
    usable = max(vmem_limit - 2 * _MIB, 4 * _MIB)      # headroom for Mosaic internals

    slab_x = R * C * x_item
    slab_out = R * C * out_item
    slab_pe = R * C * pe_item
    per_batch_pipeline = 2 * (slab_x + slab_out)       # x + out, double-buffered

    if slab_pe + per_batch_pipeline <= usable:
        # ---- Regime A: pe resident, whole batch slabs per grid step. ----
        TB = max(1, min(B_eff, (usable - slab_pe) // per_batch_pipeline))
        if B_eff >= 2:
            TB = min(TB, -(-B_eff // 2))               # keep >=2 grid steps (megacore / pipelining)
        grid = (pl.cdiv(B_eff, TB),)
        in_specs = [
            pl.BlockSpec((TB, R, C), lambda i: (i, 0, 0)),   # x tiles
            pl.BlockSpec((R, C), lambda i: (0, 0)),          # pe: constant block index -> single DMA, resident
        ]
        out_specs = pl.BlockSpec((TB, R, C), lambda i: (i, 0, 0))
        kernel = _pe_add_batched_kernel
        dim_sem = ("parallel",)
    else:
        # ---- Regime B: tile rows within each batch element (cdiv grid, ragged last tile OK). ----
        sublane_mult = 8 * max(1, 4 // x_item)
        per_row = C * (2 * (x_item + out_item) + 2 * pe_item)
        TR = (usable // per_row) // sublane_mult * sublane_mult
        TR = max(sublane_mult, min(TR, R))
        # Rows outer, batch inner: pe block index changes only with the row tile,
        # so the shared pe tile is fetched once per row tile, not per (row, batch).
        grid = (pl.cdiv(R, TR), B_eff)
        in_specs = [
            pl.BlockSpec((None, TR, C), lambda r, b: (b, r, 0)),
            pl.BlockSpec((TR, C), lambda r, b: (r, 0)),
        ]
        out_specs = pl.BlockSpec((None, TR, C), lambda r, b: (b, r, 0))
        kernel = _pe_add_rows_kernel
        dim_sem = ("parallel", "parallel")

    io_aliases = {}
    if donate_x and jnp.dtype(out_dtype) == jnp.dtype(x.dtype):
        io_aliases = {0: 0}                            # reuse x's HBM buffer when donated

    out = pl.pallas_call(
        kernel,
        out_shape=jax.ShapeDtypeStruct((B_eff, R, C), out_dtype),
        grid_spec=pltpu.PrefetchScalarGridSpec(
            num_scalar_prefetch=0,
            grid=grid,
            in_specs=in_specs,
            out_specs=out_specs,
        ),
        compiler_params=pltpu.CompilerParams(
            dimension_semantics=dim_sem,
            vmem_limit_bytes=vmem_limit,
        ),
        input_output_aliases=io_aliases,
    )(x_view, pe_view)

    return out if out.shape == (B, S, D) else out.reshape(B, S, D)


if __name__ == "__main__":
    # Small smoke-test shape.  (For shapes this tiny a fused XLA add would be
    # faster than any kernel launch; the Pallas path is exercised here purely
    # for correctness — don't benchmark this shape.)
    B, S, D = 2, 8, 32
    max_len = 5000

    key = jax.random.PRNGKey(0)
    x = jax.random.normal(key, (B, S, D), dtype=jnp.float32)

    pe = make_positional_encoding(D, max_len=max_len)

    out = positional_encoding_forward(x, pe)
    out = jax.block_until_ready(out)

    # Reference check (pure JAX, same semantics as the PyTorch forward).
    ref = x + pe[None, :S, :]
    assert out.shape == (B, S, D)
    assert out.dtype == ref.dtype
    assert jnp.allclose(out, ref, atol=1e-6), "mismatch vs reference"

    print("KERNEL_OK")
</pallas_src>

<mosaic_0001>
module attributes {stable_mosaic.version = 11 : i64} {
  func.func @_pe_add_batched_kernel(%arg0: i32, %arg1: memref<1x1x256xf32, #tpu.memory_space<vmem>>, %arg2: memref<1x256xf32, #tpu.memory_space<vmem>>, %arg3: memref<1x1x256xf32, #tpu.memory_space<vmem>>) attributes {dimension_semantics = [#tpu.dimension_semantics<parallel>], iteration_bounds = array<i64: 2>, scalar_prefetch = 0 : i64, scratch_operands = 0 : i64, tpu.core_type = #tpu.core_type<tc>, window_params = [{transform_indices = @transform_0, window_bounds = array<i64: 1, 1, 256>}, {pipeline_mode = #tpu.pipeline_mode<synchronous>, transform_indices = @transform_1, window_bounds = array<i64: 1, 256>}, {transform_indices = @transform_2, window_bounds = array<i64: 1, 1, 256>}]} {
    %c0 = arith.constant 0 : index
    %c0_0 = arith.constant 0 : index
    %c0_1 = arith.constant 0 : index
    %0 = vector.load %arg1[%c0, %c0_0, %c0_1] : memref<1x1x256xf32, #tpu.memory_space<vmem>>, vector<1x1x256xf32>
    %c0_2 = arith.constant 0 : index
    %c0_3 = arith.constant 0 : index
    %1 = vector.load %arg2[%c0_2, %c0_3] : memref<1x256xf32, #tpu.memory_space<vmem>>, vector<1x256xf32>
    %2 = vector.shape_cast %1 : vector<1x256xf32> to vector<1x1x256xf32>
    %3 = arith.addf %0, %2 : vector<1x1x256xf32>
    %c0_4 = arith.constant 0 : index
    %c0_5 = arith.constant 0 : index
    %c0_6 = arith.constant 0 : index
    %4 = vector.load %arg3[%c0_4, %c0_5, %c0_6] : memref<1x1x256xf32, #tpu.memory_space<vmem>>, vector<1x1x256xf32>
    tpu.vector_store %arg3[%c0_4, %c0_5, %c0_6], %3 {strides = array<i32>} : memref<1x1x256xf32, #tpu.memory_space<vmem>>, vector<1x1x256xf32>,
    return
  }
  func.func @transform_0(%arg0: i32) -> (i32, i32, i32) {
    %c0_i32 = arith.constant 0 : i32
    %c0_i32_0 = arith.constant 0 : i32
    %c0_i32_1 = arith.constant 0 : i32
    return %arg0, %c0_i32, %c0_i32_0 : i32, i32, i32
  }
  func.func @transform_1(%arg0: i32) -> (i32, i32) {
    %c0_i32 = arith.constant 0 : i32
    %c0_i32_0 = arith.constant 0 : i32
    %c0_i32_1 = arith.constant 0 : i32
    return %c0_i32, %c0_i32_0 : i32, i32
  }
  func.func @transform_2(%arg0: i32) -> (i32, i32, i32) {
    %c0_i32 = arith.constant 0 : i32
    %c0_i32_0 = arith.constant 0 : i32
    %c0_i32_1 = arith.constant 0 : i32
    return %arg0, %c0_i32, %c0_i32_0 : i32, i32, i32
  }
}

</mosaic_0001>

<bundles_post_ra>
// kernel: tpu_custom_call.1
= control target key start
LH: loop header
LB: loop body
LE: loop exit
PB: predicated region body
PF: predicated region fallthrough
CT: control target
= control target key end

     0   :  { %7 = vsyncpa [#allocation3], 0  ;;  %s637_s0 = inlined_call_operand.hbm [shape: f32[2,1,256], index: 0, kind: input, shape index: {}]   ;;  %s638_s1 = inlined_call_operand.hbm [shape: f32[1,256], index: 1, kind: input, shape index: {}]   ;;  %s639_s2 = inlined_call_operand.hbm [shape: f32[2,1,256], index: 2, kind: output, shape index: {}]  }
   0x1   :  { %9 = vsyncpa [#allocation3 + $0x1], 0 }
   0x2   :  { %10 = vsyncpa [#allocation6], 0 }
   0x3   :  { %11 = vsyncpa [#allocation4], 0 }
   0x4   :  { %13 = vsyncpa [#allocation4 + $0x1], 0  ;;  %s499_s9 = smov 0   ;;  %s501_s10 = smov 0  }
   0x5   :  { %s503_s11 = smov 0   ;;  %s505_s12 = smov 0  }
   0x6 LB: > { %s520_s13 = sadd.s32 4294967295, %s481_s12   ;;  %s280_s14 = sadd.s32 4294967294, %s481_s12   ;;  %s481_s12 = sphi %s505_s12, %s649_s12   ;;  %s477_s11 = sphi %s503_s11, %s648_s11   ;;  %s473_s10 = sphi %s501_s10, %s647_s10   ;;  %s469_s9 = sphi %s499_s9, %s646_s9  }
   0x7   : > { %p39_p0 = scmp.ne.s32.totalorder %s473_s10, %s469_s9  ;;  %p40_p1 = scmp.eq.s32.totalorder %s520_s13, 0 }
   0x8   : > { %p84_p2 = scmp.eq.s32.totalorder %s520_s13, 1  ;;  %p90_p3 = scmp.eq.s32.totalorder %s280_s14, 1 }
   0x9   : > { %p529_p4 = por %p40_p1, %p39_p0  ;;  %p281_p5 = scmp.ge.s32.totalorder %s481_s12, 1 }
   0xa   : > { %p534_p6 = por %p90_p3, %p39_p0  ;;  %p97_p7 = scmp.lt.s32.totalorder %s481_s12, 3 }
   0xb   : > { %s109_s19 = sshll.u32 %s638_s1, 4  ;;  %s483_s21 = smov [#allocation5]   ;;  %s110_s19 = int_to_ptr.hbm [resolvable:$true] %s109_s19 }
   0xc   : > { %p542_p8 = pnand %p281_p5, %p97_p7  ;;  %s111_s22 = sshll.u32 %s483_s21, 4  ;;  %s112_s22 = int_to_ptr.vmem [resolvable:$true] %s111_s22 }
   0xd   : > { %s552_s23 = sadd.s32 1, %s481_s12   ;;  %s26_s24 = sadd.s32 1, %s477_s11 }
   0xe   : > { %p302_p10 = pneg %p542_p8  ;;  %s23_s25 = ssub.s32 %s481_s12, %s552_s23 }
   0xf   : > { %p24_p12 = scmp.eq.s32.totalorder %s23_s25, 0  ;;  %p33_p13 = scmp.ne.s32.totalorder %s477_s11, %s473_s10 }
  0x10   : > { %p303_p11 = pnand %p302_p10, %p40_p1  ;;  %p34_p0 = scmp.eq.s32.totalorder %s481_s12, 0 }
  0x11   : > { %s561_s26 = scalar_select %p24_p12, %s477_s11, %s26_s24  }
  0x12   : > { %305 = dma.hbm_to_vmem [thread:$0]  (!%p303_p11), %s110_s19, 32, %s112_s22, [#allocation6]  }
  0x13   : > { %p565_p3 = por %p84_p2, %p33_p13  ;;  %p315_p5 = scmp.lt.s32.totalorder %s481_s12, 2 }
  0x14   : > { %s122_s28 = sand.u32 1, %s477_s11   ;;  %s285_s29 = sshll.u32 %s481_s12, 1 }
  0x15   : > { %p35_p7 = por %p34_p0, %p33_p13  ;;  %s284_s30 = sshll.u32 %s122_s28, 1 }
  0x16   : > { %s130_s5 = scalar_lea.hbm %s637_s0, %s285_s29  ;;  %s126_s7 = scalar_lea.vmem [#allocation2], %s284_s30 }
  0x17   : > { %s132_s6 = sshll.u32 %s130_s5, 4  ;;  %s134_s8 = sshll.u32 %s126_s7, 4  ;;  %s133_s6 = int_to_ptr.hbm [resolvable:$true] %s132_s6  ;;  %s135_s8 = int_to_ptr.vmem [resolvable:$true] %s134_s8 }
  0x18   : > { %p575_p10 = pnand %p315_p5, %p35_p7  ;;  %s123_s17 = scalar_lea.sflag [#allocation3], %s122_s28 }
  0x19   : > { %s381_s18 = sshra.s32 %s133_s6, 4  ;;  %s388_s24 = scalar_lea.hbm %s637_s0, 4  ;;  %s382_s18 = int_to_ptr.hbm [resolvable:$true] %s381_s18 }
  0x1a   : > { %s383_s19 = scalar_lea.hbm %s382_s18, 2  ;;  %p385_p11 = pneg %p575_p10 }
  0x1b   : > { %p384_p2 = scmp.ne.s32.totalorder %s382_s18, %s383_s19  ;;  %p389_p0 = scmp.lt.s32.totalorder %s382_s18, %s637_s0 }
  0x1c   : > { %p390_p5 = scmp.lt.s32.totalorder %s388_s24, %s383_s19 }
  0x1d   : > { %p386_p12 = pnand %p385_p11, %p384_p2 }
  0x1e   : > { %p391_p7 = por %p390_p5, %p389_p0 }
  0x1f   : > { %p387_p13 = pneg %p386_p12 }
  0x21   : > { %p392_p9 = pnand %p391_p7, %p387_p13 }
  0x23   : > { %395 = shalt.err (!%p392_p9)
}
  0x24   : > { %309 = dma.hbm_to_vmem [thread:$0]  (!%p575_p10), %s133_s6, 32, %s135_s8, %s123_s17  }
  0x25   : > { %143 = sbr.rel (%p542_p8) target bundleno = 60 (0x3c), region = 28  ;;  %s592_s28 = sand.u32 (!%p542_p8), 1, %s473_s10  }
  0x26   : > { %s287_s30 = sshll.u32 (!%p542_p8), %s592_s28, 1  ;;  %s146_s3 = scalar_lea.sflag (!%p542_p8), [#allocation3], %s592_s28 }
  0x27   : > { %s149_s4 = scalar_lea.vmem (!%p542_p8), [#allocation2], %s287_s30 }
  0x2a   : > { %456 = dma.done.wait (%p529_p4), %s146_s3, 32  }
  0x2b   : > { %458 = vsyncadd (%p529_p4), %s146_s3, 4294967264 }
  0x2c   : > { %460 = dma.done.wait (%p40_p1), [#allocation6], 32  }
  0x2d   : > { %462 = vsyncadd (%p40_p1), [#allocation6], 4294967264  ;;  %s291_s20 = sshll.u32 %s520_s13, 1  ;;  %v179_v0 = vlaneseq  ;;  %s175_s8 = scalar_lea.vmem [#allocation7], %s287_s30  ;;  %v176_v1 = vld [vmem:[%s149_s4] sm:$0x3] }
  0x2e   : > { %s195_s7 = scalar_lea.hbm %s639_s2, %s291_s20  ;;  %s197_s14 = sshll.u32 %s175_s8, 4  ;;  %v177_v2 = vld [vmem:[#allocation5] sm:$0x3]  ;;  %s198_s14 = int_to_ptr.vmem [resolvable:$true] %s197_s14 }
  0x2f   : > { %s199_s17 = sshll.u32 %s195_s7, 4  ;;  %vm181_vm0 = vcmp.lt.s32.totalorder %v179_v0, 256  ;;  %v178_v3 = vadd.f32 %v177_v2, %v176_v1  ;;  %s185_s15 = scalar_lea.sflag [#allocation4], %s592_s28  ;;  %s200_s17 = int_to_ptr.hbm [resolvable:$true] %s199_s17 }
  0x30   : > { %s425_s18 = sshra.s32 %s200_s17, 4  ;;  %s431_s22 = scalar_lea.hbm %s639_s2, 4  ;;  %s426_s18 = int_to_ptr.hbm [resolvable:$true] %s425_s18 }
  0x31   : > { %183 = vst.msk [vmem:[%s175_s8] sm:$0x3] %vm181_vm0, %v178_v3  ;;  %s427_s13 = scalar_lea.hbm %s426_s18, 2  ;;  %p432_p9 = scmp.lt.s32.totalorder %s426_s18, %s639_s2 }
  0x32   : > { %p428_p1 = scmp.ne.s32.totalorder %s426_s18, %s427_s13  ;;  %p433_p10 = scmp.lt.s32.totalorder %s431_s22, %s427_s13 }
  0x34   : > { %p429_p4 = pnand %p428_p1, %p565_p3  ;;  %p434_p2 = por %p433_p10, %p432_p9 }
  0x36   : > { %p430_p8 = pneg %p429_p4 }
  0x38   : > { %p435_p11 = pnand %p434_p2, %p430_p8 }
  0x3a   : > { %438 = shalt.err (!%p435_p11)
}
  0x3b   : > { %300 = dma.vmem_to_hbm [thread:$0]  (%p565_p3), %s198_s14, 32, %s200_s17, %s185_s15  }
  0x3c PF: > { %s211_s29 = sand.u32 1, %s469_s9   ;;  %p645_p12 = scmp.ge.s32.totalorder %s481_s12, 2 }
  0x3d   : > { %s212_s28 = scalar_lea.sflag [#allocation4], %s211_s29 }
  0x3e   : > { %p311_p13 = pnand %p645_p12, %p534_p6 }
  0x40   : > { %p312_p0 = pneg %p311_p13 }
  0x42   : > { %464 = dma.done.wait (%p312_p0), %s212_s28, 32  }
  0x43   : > { %466 = vsyncadd (%p312_p0), %s212_s28, 4294967264  ;;  %p16_p5 = scmp.ge.s32.totalorder %s552_s23, 4   ;;  %s646_s9 = smov %s473_s10 }
  0x44   : > { %s647_s10 = smov %s477_s11  ;;  %s648_s11 = smov %s561_s26 }
  0x45   : > { %s649_s12 = smov %s552_s23  ;;  %18 = sbr.rel (!%p16_p5) target bundleno = 6 (0x6), region = 77 }
  0x4a   :  { %218 = vsyncpa [#allocation3], 1 }
  0x4b   :  { %220 = vsyncpa [#allocation3 + $0x1], 1 }
  0x4c   :  { %221 = vsyncpa [#allocation6], 1 }
  0x4d   :  { %222 = vsyncpa [#allocation4], 1 }
  0x4e   :  { %224 = vsyncpa [#allocation4 + $0x1], 1 }

</bundles_post_ra>
